<compile_context>
chip_gen: v7x
topology: tpu7x:2x2x1
jax: 0.10.0
libtpu: 0.0.40
codegen_flags: <defaults>
</compile_context>

<pallas_src>
import jax
import jax.numpy as jnp
from jax import lax
from jax.experimental import pallas as pl
from jax.experimental.pallas import tpu as pltpu


def _vpode_fused_kernel(scalars_ref, nhb_ref, dt_ref,
                        z0_ref, z_anchor_ref, gconst_ref,
                        w1_ref, b1_ref, w1t_ref, w2d_ref,
                        dzdt_ref, zfin_ref):
    """One grid step = one chunk of `TS` fused drift evals + Euler updates."""
    chunk = pl.program_id(0)
    ts = dzdt_ref.shape[0]                 # steps per chunk (static)

    w_energy = scalars_ref[0]              # weight_energy
    two_reg_z = scalars_ref[1]             # 2 * reg_z (0 if reg_z <= 0)
    b2d = scalars_ref[2]                   # b2[0] - b2[1]

    # z carry lives in the VMEM-resident final-state output block.
    @pl.when(chunk == 0)
    def _():
        zfin_ref[...] = z0_ref[...]

    # Hoist all step-invariant loads out of the step loop.
    w1 = w1_ref[...]                       # (D, H)
    b1 = b1_ref[...]                       # (1, H)
    w1t = w1t_ref[...]                     # (H, D)
    w2d = w2d_ref[...]                     # (1, H) = w2[:,0] - w2[:,1]
    gconst = gconst_ref[...]               # (B, 1)
    z_anchor = z_anchor_ref[...]           # (B, D)

    def step(s, z):
        g_step = chunk * ts + s

        # ---- forward layer 1 (MXU) ----
        h_pre = jnp.dot(z, w1, preferred_element_type=jnp.float32) + b1   # (B, H)
        h = jnp.maximum(h_pre, 0.0)

        # ---- collapsed binary head (VPU + XLU + EUP, no MXU) ----
        d = jnp.sum(h * w2d, axis=-1, keepdims=True) + b2d                # (B, 1)
        p0 = 0.5 * (jnp.tanh(0.5 * d) + 1.0)                              # stable sigmoid
        # g_logits = (g, -g), g = w_energy*(1[y==0] - p0) + reg_logits*sign
        g = gconst - w_energy * p0                                        # (B, 1)

        # ---- backward through the MLP ----
        # (h_pre > 0 is the PyTorch ReLU subgradient convention; differs from
        #  jax.grad(jnp.maximum) only on the measure-zero tie h_pre == 0.)
        g_h = g * w2d                                                     # (B, H)
        g_pre = jnp.where(h_pre > 0.0, g_h, 0.0)
        g_z = jnp.dot(g_pre, w1t, preferred_element_type=jnp.float32)     # (B, D)
        # grad of  -reg_z * ||z - z_anchor||^2
        g_z = g_z - two_reg_z * (z - z_anchor)

        # ---- dz/dt = -0.5 * beta(t) * grad  (scale prefolded in SMEM) ----
        dz = nhb_ref[g_step] * g_z
        dzdt_ref[s] = dz
        # Explicit Euler (dt == 0 -> pure drift evaluation, z unchanged).
        return z + dt_ref[g_step] * dz

    z_final = lax.fori_loop(0, ts, step, zfin_ref[...], unroll=True)
    zfin_ref[...] = z_final                # once per chunk, resident block


def vpode_integrate(t_ks, dts, z0, z_anchor, y, params, *,
                    beta_min=0.1, beta_max=20.0,
                    weight_energy=1.0, reg_z=0.5, reg_logits=0.5,
                    chunk_steps=64):
    """Fused multi-step VP-ODE: one pallas_call covers all solver steps.

    Returns (dzdt_all of shape (N, B, D), z_final of shape (B, D)).
    dzdt_all[k] is exactly VPODE.forward(t_ks[k], (z_k,)) for the z_k reached
    after k explicit-Euler steps with step sizes dts[:k].
    """
    w1, b1, w2, b2 = params
    B, D = z0.shape
    H = w1.shape[1]

    t_ks = jnp.asarray(t_ks, jnp.float32).reshape(-1)
    dts = jnp.asarray(dts, jnp.float32).reshape(-1)
    N = int(t_ks.shape[0])

    ts_chunk = min(N, int(chunk_steps))
    n_chunks = -(-N // ts_chunk)
    n_pad = n_chunks * ts_chunk - N

    # Pre-fold the drift scale into the SMEM schedule.
    neg_half_beta = (-0.5 * (beta_min + t_ks * (beta_max - beta_min))).astype(jnp.float32)
    if n_pad:
        zpad = jnp.zeros((n_pad,), jnp.float32)
        neg_half_beta = jnp.concatenate([neg_half_beta, zpad])   # padded drifts -> 0
        dts = jnp.concatenate([dts, zpad])                       # dt=0 keeps z fixed

    # Python-level branch flags, exactly as in the module.
    reg_z_eff = float(reg_z) if reg_z > 0 else 0.0
    reg_logits_eff = float(reg_logits) if (0.0 < reg_logits < 1.0) else 0.0
    if reg_z_eff == 0.0 or z_anchor is None:
        z_anchor = jnp.zeros_like(z0)

    # One-time glue, constant across all ODE steps.
    w1t = jnp.transpose(w1)                                      # (H, D) backward weight
    w2d = (w2[:, 0] - w2[:, 1]).reshape(1, H).astype(jnp.float32)
    b2d = (b2[0, 0] - b2[0, 1]).astype(jnp.float32)
    y_is0 = (y[:, :1] == 0).astype(jnp.float32)                  # (B, 1)
    sgn = jnp.where(y[0, 0] == 0, 1.0, -1.0).astype(jnp.float32)
    gconst = (weight_energy * y_is0 + reg_logits_eff * sgn).astype(jnp.float32)

    scalars = jnp.stack([jnp.asarray(weight_energy, jnp.float32),
                         jnp.asarray(2.0 * reg_z_eff, jnp.float32),
                         b2d])

    smem = pl.BlockSpec(memory_space=pltpu.MemorySpace.SMEM)

    def resident(shape):
        # Full-array block whose index never changes -> stays resident in VMEM
        # across all grid steps (no per-step DMA).
        return pl.BlockSpec(shape, lambda c, _s=len(shape): (0,) * _s)

    grid_spec = pltpu.PrefetchScalarGridSpec(
        num_scalar_prefetch=0,
        grid=(n_chunks,),
        in_specs=[
            smem,                     # scalars         (3,)
            smem,                     # -0.5*beta sched (N_pad,)
            smem,                     # dt sched        (N_pad,)
            resident((B, D)),         # z0
            resident((B, D)),         # z_anchor
            resident((B, 1)),         # gconst
            resident((D, H)),         # w1
            resident((1, H)),         # b1
            resident((H, D)),         # w1^T
            resident((1, H)),         # w2[:,0]-w2[:,1]
        ],
        out_specs=[
            pl.BlockSpec((ts_chunk, B, D), lambda c: (c, 0, 0)),  # per-chunk drift slab
            pl.BlockSpec((B, D), lambda c: (0, 0)),               # final z (resident carry)
        ],
    )

    dzdt_all, z_final = pl.pallas_call(
        _vpode_fused_kernel,
        out_shape=(jax.ShapeDtypeStruct((n_chunks * ts_chunk, B, D), jnp.float32),
                   jax.ShapeDtypeStruct((B, D), jnp.float32)),
        grid_spec=grid_spec,
        compiler_params=pltpu.CompilerParams(
            dimension_semantics=("arbitrary",)),                  # z carried -> sequential
    )(scalars, neg_half_beta, dts, z0, z_anchor, gconst, w1, b1, w1t, w2d)

    if n_pad:
        dzdt_all = dzdt_all[:N]
    return dzdt_all, z_final


def vpode_forward(t_k, z, z_anchor, y, params, *,
                  beta_min=0.1, beta_max=20.0,
                  weight_energy=1.0, reg_z=0.5, reg_logits=0.5):
    """Exact Pallas equivalent of VPODE.forward(t_k, (z,)) -> (dz_dt,)."""
    t_ks = jnp.full((1,), t_k, dtype=jnp.float32)
    dts = jnp.zeros((1,), dtype=jnp.float32)
    dzdt_all, _ = vpode_integrate(t_ks, dts, z, z_anchor, y, params,
                                  beta_min=beta_min, beta_max=beta_max,
                                  weight_energy=weight_energy,
                                  reg_z=reg_z, reg_logits=reg_logits)
    return (dzdt_all[0],)


# ----------------------------- pure-JAX references -----------------------------

def _reference_dzdt(t_k, z, z_anchor, y, params, *,
                    beta_min=0.1, beta_max=20.0,
                    weight_energy=1.0, reg_z=0.5, reg_logits=0.5):
    """Mirrors the PyTorch autograd path."""
    w1, b1, w2, b2 = params
    beta_t = beta_min + t_k * (beta_max - beta_min)

    def energy_sum(zz):
        h = jnp.maximum(zz @ w1 + b1, 0.0)
        logits = h @ w2 + b2
        logp = jax.nn.log_softmax(logits, axis=-1)
        e = weight_energy * jnp.take_along_axis(logp, y[:, :1], axis=1)[:, 0]
        if reg_z > 0:
            e = e - reg_z * jnp.sum((zz - z_anchor) ** 2, axis=1)
        if 0.0 < reg_logits < 1.0:
            diff = jnp.where(y[0, 0] == 0,
                             logits[:, 0] - logits[:, 1],
                             logits[:, 1] - logits[:, 0])
            e = e + reg_logits * diff
        return jnp.sum(e)

    g = jax.grad(energy_sum)(z)
    return -0.5 * beta_t * g


def _reference_integrate(t_ks, dts, z0, z_anchor, y, params, **hp):
    z = z0
    drifts = []
    for k in range(t_ks.shape[0]):
        dz = _reference_dzdt(float(t_ks[k]), z, z_anchor, y, params, **hp)
        drifts.append(dz)
        z = z + float(dts[k]) * dz
    return jnp.stack(drifts), z


if __name__ == "__main__":
    B, D, H, C = 8, 32, 32, 2        # batch, latent dim, classifier hidden, classes

    key = jax.random.PRNGKey(0)
    kz, ka, kw1, kb1, kw2, kb2 = jax.random.split(key, 6)

    z = jax.random.normal(kz, (B, D), dtype=jnp.float32)
    z_anchor = jax.random.normal(ka, (B, D), dtype=jnp.float32)
    # target attribute labels (mixed, to exercise the per-row energy gradient)
    y = jnp.concatenate([jnp.zeros((B // 2, 1), jnp.int32),
                         jnp.ones((B - B // 2, 1), jnp.int32)], axis=0)

    # deterministic nn.Linear-style init for ccf.f[0]
    lim1 = 1.0 / (D ** 0.5)
    lim2 = 1.0 / (H ** 0.5)
    w1 = jax.random.uniform(kw1, (D, H), jnp.float32, -lim1, lim1)
    b1 = jax.random.uniform(kb1, (1, H), jnp.float32, -lim1, lim1)
    w2 = jax.random.uniform(kw2, (H, C), jnp.float32, -lim2, lim2)
    b2 = jax.random.uniform(kb2, (1, C), jnp.float32, -lim2, lim2)
    params = (w1, b1, w2, b2)

    hp = dict(beta_min=0.1, beta_max=20.0, weight_energy=1.0,
              reg_z=0.5, reg_logits=0.5)

    # ---- 1) single drift evaluation == VPODE.forward ------------------------
    t_k = 0.3
    (dz_dt,) = vpode_forward(t_k, z, z_anchor, y, params, **hp)
    dz_dt = jax.block_until_ready(dz_dt)
    ref = _reference_dzdt(t_k, z, z_anchor, y, params, **hp)
    if not jnp.allclose(dz_dt, ref, rtol=1e-4, atol=1e-4):
        raise AssertionError("Pallas VPODE drift mismatch vs JAX autograd reference")

    # ---- 2) fused multi-step integration (one kernel launch) ----------------
    n_steps = 16
    t_ks = jnp.linspace(0.3, 0.05, n_steps).astype(jnp.float32)
    dts = jnp.full((n_steps,), 0.01, dtype=jnp.float32)

    dzdt_all, z_final = vpode_integrate(t_ks, dts, z, z_anchor, y, params, **hp)
    dzdt_all = jax.block_until_ready(dzdt_all)
    z_final = jax.block_until_ready(z_final)

    ref_drifts, ref_zfin = _reference_integrate(t_ks, dts, z, z_anchor, y, params, **hp)
    if not jnp.allclose(dzdt_all, ref_drifts, rtol=2e-4, atol=1e-4):
        raise AssertionError("Pallas fused VPODE drift trajectory mismatch")
    if not jnp.allclose(z_final, ref_zfin, rtol=2e-4, atol=1e-4):
        raise AssertionError("Pallas fused VPODE final-state mismatch")

    print("KERNEL_OK")
</pallas_src>

<mosaic_0001>
module attributes {stable_mosaic.version = 11 : i64} {
  func.func @_vpode_fused_kernel(%arg0: i32, %arg1: memref<3xf32, #tpu.memory_space<smem>>, %arg2: memref<1xf32, #tpu.memory_space<smem>>, %arg3: memref<1xf32, #tpu.memory_space<smem>>, %arg4: memref<8x32xf32, #tpu.memory_space<vmem>>, %arg5: memref<8x32xf32, #tpu.memory_space<vmem>>, %arg6: memref<8x1xf32, #tpu.memory_space<vmem>>, %arg7: memref<32x32xf32, #tpu.memory_space<vmem>>, %arg8: memref<1x32xf32, #tpu.memory_space<vmem>>, %arg9: memref<32x32xf32, #tpu.memory_space<vmem>>, %arg10: memref<1x32xf32, #tpu.memory_space<vmem>>, %arg11: memref<1x8x32xf32, #tpu.memory_space<vmem>>, %arg12: memref<8x32xf32, #tpu.memory_space<vmem>>) attributes {dimension_semantics = [#tpu.dimension_semantics<arbitrary>], iteration_bounds = array<i64: 1>, scalar_prefetch = 0 : i64, scratch_operands = 0 : i64, tpu.core_type = #tpu.core_type<tc>, window_params = [{transform_indices = @transform_0, window_bounds = array<i64: 3>}, {transform_indices = @transform_1, window_bounds = array<i64: 1>}, {transform_indices = @transform_2, window_bounds = array<i64: 1>}, {pipeline_mode = #tpu.pipeline_mode<synchronous>, transform_indices = @transform_3, window_bounds = array<i64: 8, 32>}, {pipeline_mode = #tpu.pipeline_mode<synchronous>, transform_indices = @transform_4, window_bounds = array<i64: 8, 32>}, {pipeline_mode = #tpu.pipeline_mode<synchronous>, transform_indices = @transform_5, window_bounds = array<i64: 8, 1>}, {pipeline_mode = #tpu.pipeline_mode<synchronous>, transform_indices = @transform_6, window_bounds = array<i64: 32, 32>}, {pipeline_mode = #tpu.pipeline_mode<synchronous>, transform_indices = @transform_7, window_bounds = array<i64: 1, 32>}, {pipeline_mode = #tpu.pipeline_mode<synchronous>, transform_indices = @transform_8, window_bounds = array<i64: 32, 32>}, {pipeline_mode = #tpu.pipeline_mode<synchronous>, transform_indices = @transform_9, window_bounds = array<i64: 1, 32>}, {transform_indices = @transform_10, window_bounds = array<i64: 1, 8, 32>}, {pipeline_mode = #tpu.pipeline_mode<synchronous>, transform_indices = @transform_11, window_bounds = array<i64: 8, 32>}]} {
    %c0 = arith.constant 0 : index
    %0 = memref.load %arg1[%c0] : memref<3xf32, #tpu.memory_space<smem>>
    %c1 = arith.constant 1 : index
    %1 = memref.load %arg1[%c1] : memref<3xf32, #tpu.memory_space<smem>>
    %c2 = arith.constant 2 : index
    %2 = memref.load %arg1[%c2] : memref<3xf32, #tpu.memory_space<smem>>
    %c0_i32 = arith.constant 0 : i32
    %3 = arith.cmpi eq, %arg0, %c0_i32 : i32
    %4 = arith.extui %3 : i1 to i32
    %c0_i32_0 = arith.constant 0 : i32
    %5 = arith.cmpi ne, %4, %c0_i32_0 : i32
    scf.if %5 {
      %c0_29 = arith.constant 0 : index
      %c0_30 = arith.constant 0 : index
      %62 = vector.load %arg4[%c0_29, %c0_30] : memref<8x32xf32, #tpu.memory_space<vmem>>, vector<8x32xf32>
      %c0_31 = arith.constant 0 : index
      %c0_32 = arith.constant 0 : index
      %63 = vector.load %arg12[%c0_31, %c0_32] : memref<8x32xf32, #tpu.memory_space<vmem>>, vector<8x32xf32>
      tpu.vector_store %arg12[%c0_31, %c0_32], %62 {strides = array<i32>} : memref<8x32xf32, #tpu.memory_space<vmem>>, vector<8x32xf32>,
    } else {
    }
    %c0_1 = arith.constant 0 : index
    %c0_2 = arith.constant 0 : index
    %6 = vector.load %arg7[%c0_1, %c0_2] : memref<32x32xf32, #tpu.memory_space<vmem>>, vector<32x32xf32>
    %c0_3 = arith.constant 0 : index
    %c0_4 = arith.constant 0 : index
    %7 = vector.load %arg8[%c0_3, %c0_4] : memref<1x32xf32, #tpu.memory_space<vmem>>, vector<1x32xf32>
    %c0_5 = arith.constant 0 : index
    %c0_6 = arith.constant 0 : index
    %8 = vector.load %arg9[%c0_5, %c0_6] : memref<32x32xf32, #tpu.memory_space<vmem>>, vector<32x32xf32>
    %c0_7 = arith.constant 0 : index
    %c0_8 = arith.constant 0 : index
    %9 = vector.load %arg10[%c0_7, %c0_8] : memref<1x32xf32, #tpu.memory_space<vmem>>, vector<1x32xf32>
    %c0_9 = arith.constant 0 : index
    %c0_10 = arith.constant 0 : index
    %10 = vector.load %arg6[%c0_9, %c0_10] : memref<8x1xf32, #tpu.memory_space<vmem>>, vector<8x1xf32>
    %c0_11 = arith.constant 0 : index
    %c0_12 = arith.constant 0 : index
    %11 = vector.load %arg5[%c0_11, %c0_12] : memref<8x32xf32, #tpu.memory_space<vmem>>, vector<8x32xf32>
    %c0_13 = arith.constant 0 : index
    %c0_14 = arith.constant 0 : index
    %12 = vector.load %arg12[%c0_13, %c0_14] : memref<8x32xf32, #tpu.memory_space<vmem>>, vector<8x32xf32>
    %c0_i32_15 = arith.constant 0 : i32
    %c1_i32 = arith.constant 1 : i32
    %13 = arith.muli %arg0, %c1_i32 : i32
    %14 = arith.addi %13, %c0_i32_15 : i32
    %cst = arith.constant dense<0.000000e+00> : vector<8x32xf32>
    %15 = tpu.matmul %12, %6, %cst {dimension_numbers = #tpu.dot_dimension_numbers<[1], [0], [0], [1], [0, 0, 1, 1], [], []>} : vector<8x32xf32>, vector<32x32xf32>, vector<8x32xf32> -> vector<8x32xf32>
    %16 = vector.broadcast %7 : vector<1x32xf32> to vector<8x32xf32>
    %17 = arith.addf %15, %16 : vector<8x32xf32>
    %cst_16 = arith.constant 0.000000e+00 : f32
    %18 = vector.broadcast %cst_16 : f32 to vector<8x32xf32>
    %19 = arith.maximumf %17, %18 : vector<8x32xf32>
    %20 = vector.broadcast %9 : vector<1x32xf32> to vector<8x32xf32>
    %21 = arith.mulf %19, %20 : vector<8x32xf32>
    %cst_17 = arith.constant dense<0.000000e+00> : vector<8xf32>
    %22 = vector.multi_reduction <add>, %21, %cst_17 [1] : vector<8x32xf32> to vector<8xf32>
    %23 = vector.shape_cast %22 : vector<8xf32> to vector<8x1xf32>
    %24 = vector.broadcast %2 : f32 to vector<8x1xf32>
    %25 = arith.addf %23, %24 : vector<8x1xf32>
    %cst_18 = arith.constant 5.000000e-01 : f32
    %26 = vector.broadcast %cst_18 : f32 to vector<8x1xf32>
    %27 = arith.mulf %26, %25 : vector<8x1xf32>
    %28 = math.tanh %27 : vector<8x1xf32>
    %cst_19 = arith.constant 1.000000e+00 : f32
    %29 = vector.broadcast %cst_19 : f32 to vector<8x1xf32>
    %30 = arith.addf %28, %29 : vector<8x1xf32>
    %cst_20 = arith.constant 5.000000e-01 : f32
    %31 = vector.broadcast %cst_20 : f32 to vector<8x1xf32>
    %32 = arith.mulf %31, %30 : vector<8x1xf32>
    %33 = vector.broadcast %0 : f32 to vector<8x1xf32>
    %34 = arith.mulf %33, %32 : vector<8x1xf32>
    %35 = arith.subf %10, %34 : vector<8x1xf32>
    %36 = vector.broadcast %35 : vector<8x1xf32> to vector<8x32xf32>
    %37 = vector.broadcast %9 : vector<1x32xf32> to vector<8x32xf32>
    %38 = arith.mulf %36, %37 : vector<8x32xf32>
    %cst_21 = arith.constant 0.000000e+00 : f32
    %39 = vector.broadcast %cst_21 : f32 to vector<8x32xf32>
    %40 = arith.cmpf ogt, %17, %39 : vector<8x32xf32>
    %cst_22 = arith.constant 0.000000e+00 : f32
    %41 = vector.broadcast %cst_22 : f32 to vector<8x32xf32>
    %42 = arith.select %40, %38, %41 : vector<8x32xi1>, vector<8x32xf32>
    %cst_23 = arith.constant dense<0.000000e+00> : vector<8x32xf32>
    %43 = tpu.matmul %42, %8, %cst_23 {dimension_numbers = #tpu.dot_dimension_numbers<[1], [0], [0], [1], [0, 0, 1, 1], [], []>} : vector<8x32xf32>, vector<32x32xf32>, vector<8x32xf32> -> vector<8x32xf32>
    %44 = arith.subf %12, %11 : vector<8x32xf32>
    %45 = vector.broadcast %1 : f32 to vector<8x32xf32>
    %46 = arith.mulf %45, %44 : vector<8x32xf32>
    %47 = arith.subf %43, %46 : vector<8x32xf32>
    %48 = arith.index_cast %14 : i32 to index
    %49 = memref.load %arg2[%48] : memref<1xf32, #tpu.memory_space<smem>>
    %50 = vector.broadcast %49 : f32 to vector<8x32xf32>
    %51 = arith.mulf %50, %47 : vector<8x32xf32>
    %52 = arith.index_cast %c0_i32_15 : i32 to index
    %c0_24 = arith.constant 0 : index
    %c0_25 = arith.constant 0 : index
    %53 = vector.load %arg11[%52, %c0_24, %c0_25] : memref<1x8x32xf32, #tpu.memory_space<vmem>>, vector<1x8x32xf32>
    %54 = vector.shape_cast %53 : vector<1x8x32xf32> to vector<8x32xf32>
    %55 = vector.shape_cast %51 : vector<8x32xf32> to vector<1x8x32xf32>
    tpu.vector_store %arg11[%52, %c0_24, %c0_25], %55 {strides = array<i32>} : memref<1x8x32xf32, #tpu.memory_space<vmem>>, vector<1x8x32xf32>,
    %56 = arith.index_cast %14 : i32 to index
    %57 = memref.load %arg3[%56] : memref<1xf32, #tpu.memory_space<smem>>
    %58 = vector.broadcast %57 : f32 to vector<8x32xf32>
    %59 = arith.mulf %58, %51 : vector<8x32xf32>
    %60 = arith.addf %12, %59 : vector<8x32xf32>
    %c1_i32_26 = arith.constant 1 : i32
    %c0_27 = arith.constant 0 : index
    %c0_28 = arith.constant 0 : index
    %61 = vector.load %arg12[%c0_27, %c0_28] : memref<8x32xf32, #tpu.memory_space<vmem>>, vector<8x32xf32>
    tpu.vector_store %arg12[%c0_27, %c0_28], %60 {strides = array<i32>} : memref<8x32xf32, #tpu.memory_space<vmem>>, vector<8x32xf32>,
    return
  }
  func.func @transform_0(%arg0: i32) -> i32 {
    %c0_i32 = arith.constant 0 : i32
    %c0_i32_0 = arith.constant 0 : i32
    return %c0_i32 : i32
  }
  func.func @transform_1(%arg0: i32) -> i32 {
    %c0_i32 = arith.constant 0 : i32
    %c0_i32_0 = arith.constant 0 : i32
    return %c0_i32 : i32
  }
  func.func @transform_2(%arg0: i32) -> i32 {
    %c0_i32 = arith.constant 0 : i32
    %c0_i32_0 = arith.constant 0 : i32
    return %c0_i32 : i32
  }
  func.func @transform_3(%arg0: i32) -> (i32, i32) {
    %c0_i32 = arith.constant 0 : i32
    %c0_i32_0 = arith.constant 0 : i32
    %c0_i32_1 = arith.constant 0 : i32
    return %c0_i32, %c0_i32_0 : i32, i32
  }
  func.func @transform_4(%arg0: i32) -> (i32, i32) {
    %c0_i32 = arith.constant 0 : i32
    %c0_i32_0 = arith.constant 0 : i32
    %c0_i32_1 = arith.constant 0 : i32
    return %c0_i32, %c0_i32_0 : i32, i32
  }
  func.func @transform_5(%arg0: i32) -> (i32, i32) {
    %c0_i32 = arith.constant 0 : i32
    %c0_i32_0 = arith.constant 0 : i32
    %c0_i32_1 = arith.constant 0 : i32
    return %c0_i32, %c0_i32_0 : i32, i32
  }
  func.func @transform_6(%arg0: i32) -> (i32, i32) {
    %c0_i32 = arith.constant 0 : i32
    %c0_i32_0 = arith.constant 0 : i32
    %c0_i32_1 = arith.constant 0 : i32
    return %c0_i32, %c0_i32_0 : i32, i32
  }
  func.func @transform_7(%arg0: i32) -> (i32, i32) {
    %c0_i32 = arith.constant 0 : i32
    %c0_i32_0 = arith.constant 0 : i32
    %c0_i32_1 = arith.constant 0 : i32
    return %c0_i32, %c0_i32_0 : i32, i32
  }
  func.func @transform_8(%arg0: i32) -> (i32, i32) {
    %c0_i32 = arith.constant 0 : i32
    %c0_i32_0 = arith.constant 0 : i32
    %c0_i32_1 = arith.constant 0 : i32
    return %c0_i32, %c0_i32_0 : i32, i32
  }
  func.func @transform_9(%arg0: i32) -> (i32, i32) {
    %c0_i32 = arith.constant 0 : i32
    %c0_i32_0 = arith.constant 0 : i32
    %c0_i32_1 = arith.constant 0 : i32
    return %c0_i32, %c0_i32_0 : i32, i32
  }
  func.func @transform_10(%arg0: i32) -> (i32, i32, i32) {
    %c0_i32 = arith.constant 0 : i32
    %c0_i32_0 = arith.constant 0 : i32
    %c0_i32_1 = arith.constant 0 : i32
    return %arg0, %c0_i32, %c0_i32_0 : i32, i32, i32
  }
  func.func @transform_11(%arg0: i32) -> (i32, i32) {
    %c0_i32 = arith.constant 0 : i32
    %c0_i32_0 = arith.constant 0 : i32
    %c0_i32_1 = arith.constant 0 : i32
    return %c0_i32, %c0_i32_0 : i32, i32
  }
}

</mosaic_0001>

<bundles_post_ra>
// kernel: tpu_custom_call.1
= control target key start
LH: loop header
LB: loop body
LE: loop exit
PB: predicated region body
PF: predicated region fallthrough
CT: control target
= control target key end

     0   :  { %19 = vsyncpa [#allocation7], 0  ;;  %s716_s0 = inlined_call_operand.vmem [shape: f32[3], index: 0, kind: input, shape index: {}]   ;;  %s717_s1 = inlined_call_operand.<no memory space> [shape: f32[1], index: 1, kind: input, shape index: {}]   ;;  %s718_s2 = inlined_call_operand.<no memory space> [shape: f32[1], index: 2, kind: input, shape index: {}]   ;;  %s719_s3 = inlined_call_operand.hbm [shape: f32[8,32], index: 3, kind: input, shape index: {}]   ;;  %s720_s4 = inlined_call_operand.hbm [shape: f32[8,32], index: 4, kind: input, shape index: {}]   ;;  %s721_s5 = inlined_call_operand.vmem [shape: f32[8,1], index: 5, kind: input, shape index: {}]   ;;  %s722_s6 = inlined_call_operand.hbm [shape: f32[32,32], index: 6, kind: input, shape index: {}]   ;;  %s723_s7 = inlined_call_operand.vmem [shape: f32[1,32], index: 7, kind: input, shape index: {}]   ;;  %s724_s8 = inlined_call_operand.vmem [shape: f32[32,32], index: 8, kind: input, shape index: {}]   ;;  %s725_s9 = inlined_call_operand.vmem [shape: f32[1,32], index: 9, kind: input, shape index: {}]   ;;  %s726_s10 = inlined_call_operand.hbm [shape: f32[1,8,32], index: 10, kind: output, shape index: {0}]   ;;  %s727_s11 = inlined_call_operand.hbm [shape: f32[8,32], index: 11, kind: output, shape index: {1}]  }
   0x1   :  { %20 = vsyncpa [#allocation5], 0 }
   0x2   :  { %21 = vsyncpa [#allocation10], 0 }
   0x3   :  { %22 = vsyncpa [#allocation6], 0 }
   0x4   :  { %23 = vsyncpa [#allocation14], 0  ;;  %s30_s19 = sshll.u32 %s716_s0, 4  ;;  %s536_s20 = smov [#allocation9]   ;;  %s31_s19 = int_to_ptr.vmem [resolvable:$true] %s30_s19 }
   0x5   :  { %s54_s21 = sshll.u32 %s536_s20, 4  ;;  %s404_s24 = scalar_lea.hbm %s720_s4, 128  ;;  %s55_s21 = int_to_ptr.vmem [resolvable:$true] %s54_s21 }
   0x6   :  { %p405_p0 = scmp.ne.s32.totalorder %s720_s4, %s404_s24  ;;  %p408_p1 = scmp.lt.u32.totalorder %s404_s24, %s720_s4 }
   0x8   :  { %p410_p2 = pnand %p408_p1, %p405_p0 }
   0xa   :  { %413 = shalt.err (!%p410_p2)
}
   0xb   :  { %s414_s29 = scalar_lea.vmem %s55_s21, 128  ;;  %p419_p4 = scmp.lt.s32.totalorder %s55_s21, %s55_s21 }
   0xc   :  { %p415_p3 = scmp.ne.s32.totalorder %s55_s21, %s414_s29  ;;  %p420_p5 = scmp.lt.s32.totalorder %s414_s29, %s414_s29 }
   0xe   :  { %p421_p6 = por %p420_p5, %p419_p4 }
  0x10   :  { %p422_p7 = pnand %p421_p6, %p415_p3 }
  0x12   :  { %425 = shalt.err (!%p422_p7)
}
  0x13   :  { %57 = dma.hbm_to_vmem [thread:$0]  %s720_s4, 128, %s55_s21, [#allocation10]  }
  0x14   :  { %s426_s12 = scalar_lea.vmem %s31_s19, 16  ;;  %p431_p9 = scmp.lt.s32.totalorder %s31_s19, %s31_s19 }
  0x15   :  { %p427_p8 = scmp.ne.s32.totalorder %s31_s19, %s426_s12  ;;  %p432_p10 = scmp.lt.s32.totalorder %s426_s12, %s426_s12 }
  0x17   :  { %p433_p11 = por %p432_p10, %p431_p9 }
  0x19   :  { %p434_p12 = pnand %p433_p11, %p427_p8 }
  0x1b   :  { %437 = shalt.err (!%p434_p12)
}
  0x1c   :  { %s537_s13 = smov [#allocation4]   ;;  %s538_s14 = smov [#allocation8]  }
  0x1d   :  { %33 = dma.vmem_to_smem %s31_s19, 16, %s537_s13, [#allocation7]  }
  0x1e   :  { %s44_s15 = sshll.u32 %s538_s14, 4  ;;  %s539_s16 = smov [#allocation11]   ;;  %s45_s15 = int_to_ptr.vmem [resolvable:$true] %s44_s15 }
  0x1f   :  { %s65_s17 = sshll.u32 %s539_s16, 4  ;;  %s438_s4 = scalar_lea.hbm %s719_s3, 128  ;;  %s623_s17 = int_to_ptr.vmem [resolvable:$true] %s65_s17 }
  0x20   :  { %p439_p13 = scmp.ne.s32.totalorder %s719_s3, %s438_s4  ;;  %p442_p0 = scmp.lt.u32.totalorder %s438_s4, %s719_s3 }
  0x22   :  { %p444_p1 = pnand %p442_p0, %p439_p13 }
  0x24   :  { %447 = shalt.err (!%p444_p1)
}
  0x25   :  { %s448_s19 = scalar_lea.vmem %s45_s15, 128  ;;  %p453_p3 = scmp.lt.s32.totalorder %s45_s15, %s45_s15 }
  0x26   :  { %p449_p2 = scmp.ne.s32.totalorder %s45_s15, %s448_s19  ;;  %p454_p4 = scmp.lt.s32.totalorder %s448_s19, %s448_s19 }
  0x28   :  { %p455_p5 = por %p454_p4, %p453_p3 }
  0x2a   :  { %p456_p6 = pnand %p455_p5, %p449_p2 }
  0x2c   :  { %459 = shalt.err (!%p456_p6)
}
  0x2d   :  { %47 = dma.hbm_to_vmem [thread:$0]  %s719_s3, 128, %s45_s15, [#allocation5]  }
  0x2e   :  { %s460_s29 = scalar_lea.hbm %s722_s6, 512 }
  0x2f   :  { %p461_p7 = scmp.ne.s32.totalorder %s722_s6, %s460_s29  ;;  %p464_p8 = scmp.lt.u32.totalorder %s460_s29, %s722_s6 }
  0x31   :  { %p466_p9 = pnand %p464_p8, %p461_p7 }
  0x33   :  { %469 = shalt.err (!%p466_p9)
}
  0x34   :  { %s470_s14 = scalar_lea.vmem %s623_s17, 512  ;;  %p475_p11 = scmp.lt.s32.totalorder %s623_s17, %s623_s17 }
  0x35   :  { %p471_p10 = scmp.ne.s32.totalorder %s623_s17, %s470_s14  ;;  %p476_p12 = scmp.lt.s32.totalorder %s470_s14, %s470_s14 }
  0x37   :  { %p477_p13 = por %p476_p12, %p475_p11 }
  0x39   :  { %p478_p0 = pnand %p477_p13, %p471_p10 }
  0x3b   :  { %481 = shalt.err (!%p478_p0)
}
  0x3c   :  { %s540_s3 = smov 128   ;;  %s541_s15 = smov 8  }
  0x3d   :  { %71 = dma.hbm_to_vmem [thread:$0]  %s722_s6, 512, %s623_s17, [#allocation10], %s540_s3, %s540_s3, %s541_s15  }
  0x3e   :  { %526 = dma.done.wait [#allocation7], 16  }
  0x3f   :  { %527 = vsyncadd [#allocation7], 4294967280 }
  0x40   :  { %528 = dma.done.wait [#allocation5], 128  }
  0x41   :  { %529 = vsyncadd [#allocation5], 4294967168 }
  0x42   :  { %530 = dma.done.wait [#allocation10], 640  }
  0x43   :  { %531 = vsyncadd [#allocation10], 4294966656 }
  0x44   :  { %90 = sfence }
  0x45   :  { %v101_v0 = vld [vmem:[#allocation11] sm:$0xff]  ;;  %v102_v1 = vld [vmem:[#allocation11 + $0x8] sm:$0xff]  ;;  %v103_v2 = vld [vmem:[#allocation11 + $0x10] sm:$0xff]  ;;  %v542_v3 = vmov 0.0|0.0   ;;  %vm543_vm0 = vmmov 0   ;;  %v544_v6 = vmov 0.0   ;;  %v300_v44 = vstv %s717_s1 }
  0x46   :  { %377 = vmatprep.subr.bf16.mxu0 %v542_v3  ;;  %v378_v4 = vpack.c.bf16 %v102_v1, %v101_v0  ;;  %v104_v5 = vld [vmem:[#allocation11 + $0x18] sm:$0xff]  ;;  %363 = vmatprep.mubr.msk.f32.mxu0 %vm543_vm0, %v544_v6  ;;  %v98_v7 = vld [vmem:[#allocation8] sm:$0xff]  ;;  %vm99_vm1 = vcmask 261120   ;;  %v545_v18 = vmov 0   ;;  %s340_s24 = sld [smem:[#allocation4 + $0x2]]  ;;  %v108_v32 = vld [vmem:[%s724_s8 + $0x10] sm:$0xff]  ;;  %v304_v47 = vstv %s718_s2 }
  0x47   :  { %100 = vst.msk [vmem:[#allocation13] sm:$0xff] %vm99_vm1, %v98_v7  ;;  %383 = vmatprep.subr.bf16.mxu1 %v542_v3  ;;  %374 = vmatprep.mubr.msk.f32.mxu1 %vm543_vm0, %v544_v6  ;;  %v381_v8 = vpack.c.bf16 %v104_v5, %v103_v2  ;;  %v341_v10 = vld [vmem:[%s723_s7] ss:$0 sm:$0xff]  ;;  %v107_v20 = vld [vmem:[%s724_s8 + $0x8] sm:$0xff]  ;;  %v109_v33 = vld [vmem:[%s724_s8 + $0x18] sm:$0xff]  ;;  %s547_s3 = smov [#allocation13]  }
  0x48   :  { %379 = vmatpush3.bf16.msra.mxu0 %v378_v4  ;;  %v343_v14 = vld [vmem:[%s725_s9] ss:$0 sm:$0xff]  ;;  %401 = vset.pattern.permute.xlu0 %v545_v18  ;;  %s91_s9 = sld [smem:[#allocation4]]  ;;  %v387_v35 = vpack.c.bf16 %v109_v33, %v108_v32  ;;  %v112_v39 = vld [vmem:[#allocation9] sm:$0xff]  ;;  %s324_s15 = sshll.u32 %s547_s3, 4  ;;  %s325_s15 = int_to_ptr.vmem [resolvable:$true] %s324_s15 }
  0x49   :  { %380 = vmatprep.subr.bf16.mxu0 %v542_v3  ;;  %v106_v19 = vld [vmem:[%s724_s8] sm:$0xff]  ;;  %s546_s8 = smov [#allocation12]  }
  0x4a   :  { %v384_v21 = vpack.c.bf16 %v107_v20, %v106_v19  ;;  %v111_v30 = vld [vmem:[%s721_s5] sm:$0xff]  ;;  %s339_s5 = sld [smem:[#allocation4 + $0x1]]  ;;  %s314_s12 = sshll.u32 %s546_s8, 4  ;;  %s315_s12 = int_to_ptr.vmem [resolvable:$true] %s314_s12 }
  0x4b   :  { %s482_s16 = scalar_lea.vmem %s315_s12, 128  ;;  %p487_p2 = scmp.lt.s32.totalorder %s315_s12, %s315_s12 }
  0x4c   :  { %382 = vmatpush3.bf16.msra.mxu0 %v381_v8  ;;  %385 = vmatpush3.bf16.msra.mxu1 %v384_v21  ;;  %v205_v22 = vstv %s340_s24  ;;  %p483_p1 = scmp.ne.s32.totalorder %s315_s12, %s482_s16  ;;  %p488_p3 = scmp.lt.s32.totalorder %s482_s16, %s482_s16 }
  0x4d   :  { %386 = vmatprep.subr.bf16.mxu1 %v542_v3 }
  0x4e   :  { %v655_v9 = vld [vmem:[#allocation13] sm:$0xff]  ;;  %v211_v28 = vstv %s91_s9  ;;  %p489_p4 = por %p488_p3, %p487_p2 }
  0x4f   :  { %364 = vmatmul.mubr.msk.f32.vlgmr.msra.gmra.mrb[0].mxu0 %vm99_vm1, %v655_v9  ;;  %v295_v40 = vsub.f32 %v655_v9, %v112_v39 }
  0x50   :  { %388 = vmatpush3.bf16.msra.mxu1 %v387_v35  ;;  %v296_v41 = vstv %s339_s5  ;;  %p490_p5 = pnand %p489_p4, %p483_p1 }
  0x51   :  { %v297_v42 = vmul.f32 %v296_v41, %v295_v40 }
 0x122   :  { %v190_v11 = vpop.f32.mrb[0].mxu0 }
 0x123   :  { %v191_v12 = vadd.f32 %v341_v10, %v190_v11  ;;  %v365_v13 = vpop.f32.mrb[1].mxu0 }
 0x125   :  { %v194_v15 = vmax.f32 %v191_v12, 0.0  ;;  %vm220_vm2 = vcmp.gt.f32.partialorder %v191_v12, 0.0 }
 0x127   :  { %v201_v16 = vmul.f32 %v343_v14, %v194_v15 }
 0x129   :  { %v202_v17 = vsel %vm99_vm1, %v201_v16, 0.0 }
 0x12a   :  { %203 = vadd.xlane.f32.xlu0 %v202_v17 }
 0x1b7   :  { %v204_v23 = vpop.xlane.xlu0 %203 }
 0x1b8   :  { %v206_v24 = vadd.f32 %v205_v22, %v204_v23 }
 0x1ba   :  { %v207_v25 = vmul.f32 0.5, %v206_v24 }
 0x1bc   :  { %402 = vtanh.f32 %v207_v25 }
 0x1c6   :  { %v403_v26 = vpop.eup %402 }
 0x1c7   :  { %v209_v27 = vadd.f32 1.0, %v403_v26 }
 0x1c9   :  { %v210_v29 = vmul.f32 0.5, %v209_v27 }
 0x1cb   :  { %v212_v31 = vmul.f32 %v211_v28, %v210_v29 }
 0x1cd   :  { %v213_v34 = vsub.f32 %v111_v30, %v212_v31 }
 0x1cf   :  { %216 = vperm.xlu0 %401, %v213_v34  }
 0x24e   :  { %v217_v36 = vpop.permute.xlu0 %216 }
 0x24f   :  { %v219_v37 = vmul.f32 %v343_v14, %v217_v36 }
 0x251   :  { %v221_v38 = vsel %vm220_vm2, %v219_v37, 0.0 }
 0x252   :  { %375 = vmatmul.mubr.msk.f32.vlgmr.msra.gmra.mrb[0].mxu1 %vm99_vm1, %v221_v38 }
 0x325   :  { %v291_v43 = vpop.f32.mrb[0].mxu1 }
 0x326   :  { %v298_v45 = vsub.f32 %v291_v43, %v297_v42  ;;  %v376_v46 = vpop.f32.mrb[1].mxu1 }
 0x328   :  { %v301_v48 = vmul.f32 %v300_v44, %v298_v45 }
 0x32a   :  { %302 = vst.msk [vmem:[#allocation12] sm:$0xff] %vm99_vm1, %v301_v48  ;;  %v305_v49 = vmul.f32 %v304_v47, %v301_v48 }
 0x32b   :  { %493 = shalt.err (!%p490_p5)
}
 0x32c   :  { %s494_s6 = scalar_lea.hbm %s726_s10, 128 }
 0x32d   :  { %p495_p6 = scmp.ne.s32.totalorder %s726_s10, %s494_s6  ;;  %p498_p7 = scmp.lt.u32.totalorder %s494_s6, %s726_s10 }
 0x32f   :  { %p500_p8 = pnand %p498_p7, %p495_p6 }
 0x331   :  { %503 = shalt.err (!%p500_p8)
}
 0x332   :  { %317 = dma.vmem_to_hbm [thread:$0]  %s315_s12, 128, %s726_s10, [#allocation6]   ;;  %v306_v50 = vadd.f32 %v305_v49, %v655_v9 }
 0x333   :  { %s504_s23 = scalar_lea.vmem %s325_s15, 128  ;;  %p509_p10 = scmp.lt.s32.totalorder %s325_s15, %s325_s15 }
 0x334   :  { %307 = vst.msk [vmem:[#allocation13] sm:$0xff] %vm99_vm1, %v306_v50  ;;  %p505_p9 = scmp.ne.s32.totalorder %s325_s15, %s504_s23  ;;  %p510_p11 = scmp.lt.s32.totalorder %s504_s23, %s504_s23 }
 0x336   :  { %p511_p12 = por %p510_p11, %p509_p10 }
 0x338   :  { %p512_p13 = pnand %p511_p12, %p505_p9 }
 0x33a   :  { %515 = shalt.err (!%p512_p13)
}
 0x33b   :  { %s516_s9 = scalar_lea.hbm %s727_s11, 128 }
 0x33c   :  { %p517_p0 = scmp.ne.s32.totalorder %s727_s11, %s516_s9  ;;  %p520_p1 = scmp.lt.u32.totalorder %s516_s9, %s727_s11 }
 0x33e   :  { %p522_p2 = pnand %p520_p1, %p517_p0 }
 0x340   :  { %525 = shalt.err (!%p522_p2)
}
 0x341   :  { %327 = dma.vmem_to_hbm [thread:$0]  %s325_s15, 128, %s727_s11, [#allocation14]  }
 0x342   :  { %532 = dma.done.wait [#allocation6], 128  }
 0x343   :  { %533 = vsyncadd [#allocation6], 4294967168 }
 0x344   :  { %534 = dma.done.wait [#allocation14], 128  }
 0x345   :  { %535 = vsyncadd [#allocation14], 4294967168 }
 0x346   :  { %334 = vsyncpa [#allocation5], 1 }
 0x347   :  { %335 = vsyncpa [#allocation10], 1 }
 0x348   :  { %336 = vsyncpa [#allocation6], 1 }
 0x349   :  { %337 = vsyncpa [#allocation14], 1 }
 0x34a   :  { %338 = vsyncpa [#allocation7], 1 }

</bundles_post_ra>
